<compile_context>
chip_gen: v7x
topology: tpu7x:2x2x1
jax: 0.10.0
libtpu: 0.0.40
codegen_flags: <defaults>
</compile_context>

<pallas_src>
import jax
import jax.numpy as jnp
from jax.experimental import pallas as pl
from jax.experimental.pallas import tpu as pltpu

_LANE = 128       # lane width: hidden dims padded to multiples of this
_SUBLANE = 8      # f32 sublane: multi-step batch tiles must be multiples of 8
_C_PAD = 8        # stored class width (3 real classes padded to 8)
_NEG_PAD = -1e30  # effectively -inf bias for padded softmax columns
_TILE_CAP = 2048  # max batch rows per grid step


def mlp_kernel(x_ref, w1_ref, b1_ref, w2_ref, b2_ref, w3_ref, b3_ref, o_ref):
    # Layer 1: Linear + ReLU (MXU matmul, f32 accumulation)
    h1 = jnp.dot(x_ref[...], w1_ref[...], preferred_element_type=jnp.float32)
    h1 = jnp.maximum(h1 + b1_ref[...], 0.0)

    # Layer 2: Linear + ReLU
    h2 = jnp.dot(h1, w2_ref[...], preferred_element_type=jnp.float32)
    h2 = jnp.maximum(h2 + b2_ref[...], 0.0)

    # Layer 3: Linear + softmax over the (8-wide, padded) class axis.
    # Padded logit columns carry a -1e30 bias, so exp underflows to exactly 0
    # and they do not perturb the normalization.
    logits = jnp.dot(h2, w3_ref[...], preferred_element_type=jnp.float32)
    logits = logits + b3_ref[...]
    m = jnp.max(logits, axis=1, keepdims=True)
    e = jnp.exp(logits - m)
    denom = jnp.sum(e, axis=1, keepdims=True)
    # approx=False: full-precision reciprocal so the 1e-5 tolerance holds.
    o_ref[...] = (e * pl.reciprocal(denom, approx=False)).astype(o_ref.dtype)


def _round_up(v, m):
    return (v + m - 1) // m * m


def _cdiv(a, b):
    return -(-a // b)


def _tensorcores_per_chip():
    # Heuristic: v7x has 2 TensorCores per chip; v5e/v6e have 1.
    try:
        kind = jax.devices()[0].device_kind.lower()
        if "v7" in kind:
            return 2
    except Exception:
        pass
    return 1


def _choose_batch_tile(B, n_tc):
    # Single-TC chips: one grid step unless the batch exceeds the tile cap.
    # v7x: keep an even number of >=2 grid steps so both TCs stay busy.
    min_steps = 2 if (n_tc >= 2 and B >= 2 * _SUBLANE) else 1
    n_steps = max(min_steps, _cdiv(B, _TILE_CAP))
    if n_tc >= 2 and n_steps > 1 and (n_steps % 2):
        n_steps += 1
    if n_steps == 1:
        return B  # full batch in one step, zero batch padding
    return _round_up(_cdiv(B, n_steps), _SUBLANE)


def prepare_params(w1, b1, w2, b2, w3, b3):
    """One-time padding of weights/biases to kernel layout (call at setup)."""
    D, H1 = w1.shape
    H2 = w2.shape[1]
    C = w3.shape[1]
    H1p = _round_up(H1, _LANE)
    H2p = _round_up(H2, _LANE)
    Cp = _round_up(C, _C_PAD)

    w1p = jnp.zeros((D, H1p), jnp.float32).at[:, :H1].set(w1)
    b1p = jnp.zeros((1, H1p), jnp.float32).at[:, :H1].set(b1.reshape(1, H1))
    w2p = jnp.zeros((H1p, H2p), jnp.float32).at[:H1, :H2].set(w2)
    b2p = jnp.zeros((1, H2p), jnp.float32).at[:, :H2].set(b2.reshape(1, H2))
    w3p = jnp.zeros((H2p, Cp), jnp.float32).at[:H2, :C].set(w3)
    b3p = jnp.full((1, Cp), _NEG_PAD, jnp.float32).at[:, :C].set(b3.reshape(1, C))
    return (w1p, b1p, w2p, b2p, w3p, b3p, C)


def mlp_forward(x, params, *, batch_tile=None):
    w1p, b1p, w2p, b2p, w3p, b3p, C = params
    B, D = x.shape
    H1p = w1p.shape[1]
    H2p = w2p.shape[1]
    Cp = w3p.shape[1]

    # ---- Batch tiling -----------------------------------------------------
    if batch_tile is None:
        batch_tile = _choose_batch_tile(B, _tensorcores_per_chip())
    grid_steps = _cdiv(B, batch_tile)
    Bp = grid_steps * batch_tile
    xp = x if Bp == B else jnp.zeros((Bp, D), x.dtype).at[:B].set(x)

    out_padded = pl.pallas_call(
        mlp_kernel,
        out_shape=jax.ShapeDtypeStruct((Bp, Cp), jnp.float32),
        grid_spec=pltpu.PrefetchScalarGridSpec(
            num_scalar_prefetch=0,
            grid=(grid_steps,),
            in_specs=[
                # x: tiled over batch (double-buffered by the pipeline)
                pl.BlockSpec((batch_tile, D), lambda i: (i, 0)),
                # Weights / biases: full arrays, constant index_map -> loaded
                # once and kept resident in VMEM for all grid steps.
                pl.BlockSpec((D, H1p), lambda i: (0, 0),
                             memory_space=pltpu.MemorySpace.VMEM),
                pl.BlockSpec((1, H1p), lambda i: (0, 0),
                             memory_space=pltpu.MemorySpace.VMEM),
                pl.BlockSpec((H1p, H2p), lambda i: (0, 0),
                             memory_space=pltpu.MemorySpace.VMEM),
                pl.BlockSpec((1, H2p), lambda i: (0, 0),
                             memory_space=pltpu.MemorySpace.VMEM),
                pl.BlockSpec((H2p, Cp), lambda i: (0, 0),
                             memory_space=pltpu.MemorySpace.VMEM),
                pl.BlockSpec((1, Cp), lambda i: (0, 0),
                             memory_space=pltpu.MemorySpace.VMEM),
            ],
            # Narrow (8-wide) output block: ~16x less HBM writeback than a
            # 128-wide padded store; last dim equals the full array dim.
            out_specs=pl.BlockSpec((batch_tile, Cp), lambda i: (i, 0)),
        ),
        compiler_params=pltpu.CompilerParams(
            dimension_semantics=("parallel",),  # batch axis shards across TCs
        ),
    )(xp, w1p, b1p, w2p, b2p, w3p, b3p)

    # Strip batch and class padding outside the kernel.
    return out_padded[:B, :C]


def _init_linear(key, fan_in, fan_out):
    # Deterministic init mimicking PyTorch's default uniform(-1/sqrt(fan_in), ...).
    kw, kb = jax.random.split(key)
    bound = 1.0 / (fan_in ** 0.5)
    w = jax.random.uniform(kw, (fan_in, fan_out), jnp.float32, -bound, bound)
    b = jax.random.uniform(kb, (fan_out,), jnp.float32, -bound, bound)
    return w, b


def _reference(x, w1, b1, w2, b2, w3, b3):
    h1 = jnp.maximum(x @ w1 + b1, 0.0)
    h2 = jnp.maximum(h1 @ w2 + b2, 0.0)
    logits = h2 @ w3 + b3
    return jax.nn.softmax(logits, axis=1)


if __name__ == "__main__":
    key = jax.random.PRNGKey(0)
    k_x, k1, k2, k3 = jax.random.split(key, 4)

    batch, input_dim = 128, 32
    x = jax.random.normal(k_x, (batch, input_dim), jnp.float32)

    w1, b1 = _init_linear(k1, input_dim, 50)
    w2, b2 = _init_linear(k2, 50, 50)
    w3, b3 = _init_linear(k3, 50, 3)

    # One-time weight/bias padding (hoisted out of the per-call path).
    params = prepare_params(w1, b1, w2, b2, w3, b3)

    out = mlp_forward(x, params)
    out = jax.block_until_ready(out)

    ref = _reference(x, w1, b1, w2, b2, w3, b3)
    assert out.shape == (batch, 3)
    assert jnp.allclose(out, ref, atol=1e-5, rtol=1e-5)

    print("KERNEL_OK")
</pallas_src>

<mosaic_0001>
module attributes {stable_mosaic.version = 11 : i64} {
  func.func @mlp_kernel(%arg0: i32, %arg1: memref<128x32xf32, #tpu.memory_space<vmem>>, %arg2: memref<32x128xf32, #tpu.memory_space<vmem>>, %arg3: memref<1x128xf32, #tpu.memory_space<vmem>>, %arg4: memref<128x128xf32, #tpu.memory_space<vmem>>, %arg5: memref<1x128xf32, #tpu.memory_space<vmem>>, %arg6: memref<128x8xf32, #tpu.memory_space<vmem>>, %arg7: memref<1x8xf32, #tpu.memory_space<vmem>>, %arg8: memref<128x8xf32, #tpu.memory_space<vmem>>) attributes {dimension_semantics = [#tpu.dimension_semantics<parallel>], iteration_bounds = array<i64: 1>, scalar_prefetch = 0 : i64, scratch_operands = 0 : i64, tpu.core_type = #tpu.core_type<tc>, window_params = [{transform_indices = @transform_0, window_bounds = array<i64: 128, 32>}, {pipeline_mode = #tpu.pipeline_mode<synchronous>, transform_indices = @transform_1, window_bounds = array<i64: 32, 128>}, {pipeline_mode = #tpu.pipeline_mode<synchronous>, transform_indices = @transform_2, window_bounds = array<i64: 1, 128>}, {pipeline_mode = #tpu.pipeline_mode<synchronous>, transform_indices = @transform_3, window_bounds = array<i64: 128, 128>}, {pipeline_mode = #tpu.pipeline_mode<synchronous>, transform_indices = @transform_4, window_bounds = array<i64: 1, 128>}, {pipeline_mode = #tpu.pipeline_mode<synchronous>, transform_indices = @transform_5, window_bounds = array<i64: 128, 8>}, {pipeline_mode = #tpu.pipeline_mode<synchronous>, transform_indices = @transform_6, window_bounds = array<i64: 1, 8>}, {transform_indices = @transform_7, window_bounds = array<i64: 128, 8>}]} {
    %c0 = arith.constant 0 : index
    %c0_0 = arith.constant 0 : index
    %0 = vector.load %arg1[%c0, %c0_0] : memref<128x32xf32, #tpu.memory_space<vmem>>, vector<128x32xf32>
    %c0_1 = arith.constant 0 : index
    %c0_2 = arith.constant 0 : index
    %1 = vector.load %arg2[%c0_1, %c0_2] : memref<32x128xf32, #tpu.memory_space<vmem>>, vector<32x128xf32>
    %cst = arith.constant dense<0.000000e+00> : vector<128x128xf32>
    %2 = tpu.matmul %0, %1, %cst {dimension_numbers = #tpu.dot_dimension_numbers<[1], [0], [0], [1], [0, 0, 1, 1], [], []>} : vector<128x32xf32>, vector<32x128xf32>, vector<128x128xf32> -> vector<128x128xf32>
    %c0_3 = arith.constant 0 : index
    %c0_4 = arith.constant 0 : index
    %3 = vector.load %arg3[%c0_3, %c0_4] : memref<1x128xf32, #tpu.memory_space<vmem>>, vector<1x128xf32>
    %4 = vector.broadcast %3 : vector<1x128xf32> to vector<128x128xf32>
    %5 = arith.addf %2, %4 : vector<128x128xf32>
    %cst_5 = arith.constant 0.000000e+00 : f32
    %6 = vector.broadcast %cst_5 : f32 to vector<128x128xf32>
    %7 = arith.maximumf %5, %6 : vector<128x128xf32>
    %c0_6 = arith.constant 0 : index
    %c0_7 = arith.constant 0 : index
    %8 = vector.load %arg4[%c0_6, %c0_7] : memref<128x128xf32, #tpu.memory_space<vmem>>, vector<128x128xf32>
    %cst_8 = arith.constant dense<0.000000e+00> : vector<128x128xf32>
    %9 = tpu.matmul %7, %8, %cst_8 {dimension_numbers = #tpu.dot_dimension_numbers<[1], [0], [0], [1], [0, 0, 1, 1], [], []>} : vector<128x128xf32>, vector<128x128xf32>, vector<128x128xf32> -> vector<128x128xf32>
    %c0_9 = arith.constant 0 : index
    %c0_10 = arith.constant 0 : index
    %10 = vector.load %arg5[%c0_9, %c0_10] : memref<1x128xf32, #tpu.memory_space<vmem>>, vector<1x128xf32>
    %11 = vector.broadcast %10 : vector<1x128xf32> to vector<128x128xf32>
    %12 = arith.addf %9, %11 : vector<128x128xf32>
    %cst_11 = arith.constant 0.000000e+00 : f32
    %13 = vector.broadcast %cst_11 : f32 to vector<128x128xf32>
    %14 = arith.maximumf %12, %13 : vector<128x128xf32>
    %c0_12 = arith.constant 0 : index
    %c0_13 = arith.constant 0 : index
    %15 = vector.load %arg6[%c0_12, %c0_13] : memref<128x8xf32, #tpu.memory_space<vmem>>, vector<128x8xf32>
    %cst_14 = arith.constant dense<0.000000e+00> : vector<128x8xf32>
    %16 = tpu.matmul %14, %15, %cst_14 {dimension_numbers = #tpu.dot_dimension_numbers<[1], [0], [0], [1], [0, 0, 1, 1], [], []>} : vector<128x128xf32>, vector<128x8xf32>, vector<128x8xf32> -> vector<128x8xf32>
    %c0_15 = arith.constant 0 : index
    %c0_16 = arith.constant 0 : index
    %17 = vector.load %arg7[%c0_15, %c0_16] : memref<1x8xf32, #tpu.memory_space<vmem>>, vector<1x8xf32>
    %18 = vector.broadcast %17 : vector<1x8xf32> to vector<128x8xf32>
    %19 = arith.addf %16, %18 : vector<128x8xf32>
    %cst_17 = arith.constant dense<0xFF800000> : vector<128xf32>
    %20 = vector.multi_reduction <maximumf>, %19, %cst_17 [1] : vector<128x8xf32> to vector<128xf32>
    %21 = vector.shape_cast %20 : vector<128xf32> to vector<128x1xf32>
    %22 = vector.broadcast %21 : vector<128x1xf32> to vector<128x8xf32>
    %23 = arith.subf %19, %22 : vector<128x8xf32>
    %24 = math.exp %23 : vector<128x8xf32>
    %cst_18 = arith.constant dense<0.000000e+00> : vector<128xf32>
    %25 = vector.multi_reduction <add>, %24, %cst_18 [1] : vector<128x8xf32> to vector<128xf32>
    %26 = vector.shape_cast %25 : vector<128xf32> to vector<128x1xf32>
    %27 = tpu.reciprocal %26 : vector<128x1xf32> -> vector<128x1xf32>
    %28 = vector.broadcast %27 : vector<128x1xf32> to vector<128x8xf32>
    %29 = arith.mulf %24, %28 : vector<128x8xf32>
    %c0_19 = arith.constant 0 : index
    %c0_20 = arith.constant 0 : index
    %30 = vector.load %arg8[%c0_19, %c0_20] : memref<128x8xf32, #tpu.memory_space<vmem>>, vector<128x8xf32>
    tpu.vector_store %arg8[%c0_19, %c0_20], %29 {strides = array<i32>} : memref<128x8xf32, #tpu.memory_space<vmem>>, vector<128x8xf32>,
    return
  }
  func.func @transform_0(%arg0: i32) -> (i32, i32) {
    %c0_i32 = arith.constant 0 : i32
    %c0_i32_0 = arith.constant 0 : i32
    return %arg0, %c0_i32 : i32, i32
  }
  func.func @transform_1(%arg0: i32) -> (i32, i32) {
    %c0_i32 = arith.constant 0 : i32
    %c0_i32_0 = arith.constant 0 : i32
    %c0_i32_1 = arith.constant 0 : i32
    return %c0_i32, %c0_i32_0 : i32, i32
  }
  func.func @transform_2(%arg0: i32) -> (i32, i32) {
    %c0_i32 = arith.constant 0 : i32
    %c0_i32_0 = arith.constant 0 : i32
    %c0_i32_1 = arith.constant 0 : i32
    return %c0_i32, %c0_i32_0 : i32, i32
  }
  func.func @transform_3(%arg0: i32) -> (i32, i32) {
    %c0_i32 = arith.constant 0 : i32
    %c0_i32_0 = arith.constant 0 : i32
    %c0_i32_1 = arith.constant 0 : i32
    return %c0_i32, %c0_i32_0 : i32, i32
  }
  func.func @transform_4(%arg0: i32) -> (i32, i32) {
    %c0_i32 = arith.constant 0 : i32
    %c0_i32_0 = arith.constant 0 : i32
    %c0_i32_1 = arith.constant 0 : i32
    return %c0_i32, %c0_i32_0 : i32, i32
  }
  func.func @transform_5(%arg0: i32) -> (i32, i32) {
    %c0_i32 = arith.constant 0 : i32
    %c0_i32_0 = arith.constant 0 : i32
    %c0_i32_1 = arith.constant 0 : i32
    return %c0_i32, %c0_i32_0 : i32, i32
  }
  func.func @transform_6(%arg0: i32) -> (i32, i32) {
    %c0_i32 = arith.constant 0 : i32
    %c0_i32_0 = arith.constant 0 : i32
    %c0_i32_1 = arith.constant 0 : i32
    return %c0_i32, %c0_i32_0 : i32, i32
  }
  func.func @transform_7(%arg0: i32) -> (i32, i32) {
    %c0_i32 = arith.constant 0 : i32
    %c0_i32_0 = arith.constant 0 : i32
    return %arg0, %c0_i32 : i32, i32
  }
}

</mosaic_0001>

<bundles_post_ra>
// kernel: tpu_custom_call.1
= control target key start
LH: loop header
LB: loop body
LE: loop exit
PB: predicated region body
PF: predicated region fallthrough
CT: control target
= control target key end

     0   :  { %vm53_vm0 = vcmask 261120   ;;  %vm615_vm1 = vcmask 64512   ;;  %s1698_s1 = inlined_call_operand.vmem [shape: f32[32,128], index: 1, kind: input, shape index: {}]   ;;  %s1699_s0 = inlined_call_operand.vmem [shape: f32[128,32], index: 0, kind: input, shape index: {}]   ;;  %s1700_s3 = inlined_call_operand.vmem [shape: f32[128,128], index: 3, kind: input, shape index: {}]   ;;  %s1701_s5 = inlined_call_operand.vmem [shape: f32[128,8], index: 5, kind: input, shape index: {}]   ;;  %s1702_s2 = inlined_call_operand.vmem [shape: f32[1,128], index: 2, kind: input, shape index: {}]   ;;  %s1703_s4 = inlined_call_operand.vmem [shape: f32[1,128], index: 4, kind: input, shape index: {}]   ;;  %s1704_s6 = inlined_call_operand.vmem [shape: f32[1,8], index: 6, kind: input, shape index: {}]   ;;  %s1705_s7 = inlined_call_operand.vmem [shape: f32[128,8], index: 7, kind: output, shape index: {}]  }
   0x1   :  { %v42_v0 = vld [vmem:[%s1698_s1] sm:$0xff]  ;;  %v43_v1 = vld [vmem:[%s1698_s1 + $0x8] sm:$0xff]  ;;  %v44_v2 = vld [vmem:[%s1698_s1 + $0x10] sm:$0xff] }
   0x2   :  { %v1059_v3 = vpack.c.bf16 %v43_v1, %v42_v0  ;;  %v45_v4 = vld [vmem:[%s1698_s1 + $0x18] sm:$0xff]  ;;  %v26_v5 = vld [vmem:[%s1699_s0] sm:$0xff]  ;;  %v264_v8 = vld [vmem:[%s1700_s3 + $0x8] sm:$0xff] }
   0x3   :  { %v1063_v6 = vpack.c.bf16 %v45_v4, %v44_v2  ;;  %923 = vmatprep.mubr.msk.f32.mxu0 %vm53_vm0, %v26_v5  ;;  %v263_v7 = vld [vmem:[%s1700_s3] sm:$0xff]  ;;  %v265_v9 = vld [vmem:[%s1700_s3 + $0x10] sm:$0xff]  ;;  %v266_v10 = vld [vmem:[%s1700_s3 + $0x18] sm:$0xff] }
   0x4   :  { %1060 = vmatprep.subr.bf16.mxu0 %v1059_v3  ;;  %v27_v11 = vld [vmem:[%s1699_s0 + $0x8] sm:$0xff]  ;;  %v1067_v12 = vpack.c.bf16 %v264_v8, %v263_v7  ;;  %v1071_v13 = vpack.c.bf16 %v266_v10, %v265_v9  ;;  %v28_v14 = vld [vmem:[%s1699_s0 + $0x10] sm:$0xff]  ;;  %v267_v15 = vld [vmem:[%s1700_s3 + $0x20] sm:$0xff] }
   0x5   :  { %1062 = vmatpush3.bf16.msra.mxu0 %v1059_v3  ;;  %v268_v16 = vld [vmem:[%s1700_s3 + $0x28] sm:$0xff]  ;;  %v29_v17 = vld [vmem:[%s1699_s0 + $0x18] sm:$0xff]  ;;  %v30_v19 = vld [vmem:[%s1699_s0 + $0x20] sm:$0xff] }
   0x6   :  { %1064 = vmatprep.subr.bf16.mxu0 %v1063_v6  ;;  %1068 = vmatprep.subr.bf16.mxu1 %v1067_v12  ;;  %v1075_v18 = vpack.c.bf16 %v268_v16, %v267_v15  ;;  %v269_v20 = vld [vmem:[%s1700_s3 + $0x30] sm:$0xff]  ;;  %v270_v21 = vld [vmem:[%s1700_s3 + $0x38] sm:$0xff]  ;;  %v31_v22 = vld [vmem:[%s1699_s0 + $0x28] sm:$0xff] }
   0x7   :  { %1070 = vmatpush3.bf16.msra.mxu1 %v1067_v12  ;;  %v1079_v23 = vpack.c.bf16 %v270_v21, %v269_v20  ;;  %v32_v24 = vld [vmem:[%s1699_s0 + $0x30] sm:$0xff]  ;;  %v271_v25 = vld [vmem:[%s1700_s3 + $0x40] sm:$0xff]  ;;  %v272_v26 = vld [vmem:[%s1700_s3 + $0x48] sm:$0xff] }
   0x8   :  { %1072 = vmatprep.subr.bf16.mxu1 %v1071_v13  ;;  %v33_v27 = vld [vmem:[%s1699_s0 + $0x38] sm:$0xff]  ;;  %v1083_v28 = vpack.c.bf16 %v272_v26, %v271_v25  ;;  %v34_v29 = vld [vmem:[%s1699_s0 + $0x40] sm:$0xff]  ;;  %v273_v30 = vld [vmem:[%s1700_s3 + $0x50] sm:$0xff] }
   0x9   :  { %1066 = vmatpush3.bf16.msra.mxu0 %v1063_v6  ;;  %v274_v31 = vld [vmem:[%s1700_s3 + $0x58] sm:$0xff]  ;;  %v35_v32 = vld [vmem:[%s1699_s0 + $0x48] sm:$0xff]  ;;  %v36_v34 = vld [vmem:[%s1699_s0 + $0x50] sm:$0xff] }
   0xa   :  { %v1087_v33 = vpack.c.bf16 %v274_v31, %v273_v30  ;;  %v275_v35 = vld [vmem:[%s1700_s3 + $0x60] sm:$0xff]  ;;  %v276_v36 = vld [vmem:[%s1700_s3 + $0x68] sm:$0xff]  ;;  %v37_v37 = vld [vmem:[%s1699_s0 + $0x58] sm:$0xff] }
   0xb   :  { %1074 = vmatpush3.bf16.msra.mxu1 %v1071_v13  ;;  %v1091_v38 = vpack.c.bf16 %v276_v36, %v275_v35  ;;  %v38_v39 = vld [vmem:[%s1699_s0 + $0x60] sm:$0xff]  ;;  %v39_v40 = vld [vmem:[%s1699_s0 + $0x68] sm:$0xff]  ;;  %v40_v41 = vld [vmem:[%s1699_s0 + $0x70] sm:$0xff] }
   0xc   :  { %924 = vmatmul.mubr.msk.f32.vlgmr.msra.gmra.mrb[0].mxu0 %vm53_vm0, %v27_v11  ;;  %1076 = vmatprep.subr.bf16.mxu1 %v1075_v18  ;;  %v41_v42 = vld [vmem:[%s1699_s0 + $0x78] sm:$0xff]  ;;  %v277_v43 = vld [vmem:[%s1700_s3 + $0x70] sm:$0xff]  ;;  %v447_v46 = vld [vmem:[%s1701_s5] sm:$0xff] }
   0xd   :  { %926 = vmatprep.mubr.msk.f32.mxu0 %vm53_vm0, %v28_v14  ;;  %v278_v44 = vld [vmem:[%s1700_s3 + $0x78] sm:$0xff]  ;;  %v448_v47 = vld [vmem:[%s1701_s5 + $0x8] sm:$0xff]  ;;  %v449_v48 = vld [vmem:[%s1701_s5 + $0x10] sm:$0xff] }
   0xe   :  { %v1095_v45 = vpack.c.bf16 %v278_v44, %v277_v43  ;;  %v1099_v49 = vpack.c.bf16 %v448_v47, %v447_v46  ;;  %v450_v50 = vld [vmem:[%s1701_s5 + $0x18] sm:$0xff]  ;;  %v451_v52 = vld [vmem:[%s1701_s5 + $0x20] sm:$0xff]  ;;  %v452_v53 = vld [vmem:[%s1701_s5 + $0x28] sm:$0xff] }
   0xf   :  { %1078 = vmatpush3.bf16.msra.mxu1 %v1075_v18  ;;  %v1103_v51 = vpack.c.bf16 %v450_v50, %v449_v48  ;;  %v1107_v54 = vpack.c.bf16 %v452_v53, %v451_v52  ;;  %v453_v55 = vld [vmem:[%s1701_s5 + $0x30] sm:$0xff]  ;;  %v454_v56 = vld [vmem:[%s1701_s5 + $0x38] sm:$0xff]  ;;  %v455_v58 = vld [vmem:[%s1701_s5 + $0x40] sm:$0xff] }
  0x10   :  { %927 = vmatmul.mubr.msk.f32.gmra.mrb[2].mxu0 %vm53_vm0, %v29_v17  ;;  %1080 = vmatprep.subr.bf16.mxu1 %v1079_v23  ;;  %v1399_v57 = vpack.c.bf16 %v454_v56, %v453_v55  ;;  %v456_v59 = vld [vmem:[%s1701_s5 + $0x48] sm:$0xff]  ;;  %v457_v61 = vld [vmem:[%s1701_s5 + $0x50] sm:$0xff]  ;;  %v458_v62 = vld [vmem:[%s1701_s5 + $0x58] sm:$0xff] }
  0x11   :  { %929 = vmatprep.mubr.msk.f32.mxu0 %vm53_vm0, %v30_v19  ;;  %1100 = vmatprep.subr.bf16.mxu0 %v1099_v49  ;;  %v1408_v60 = vpack.c.bf16 %v456_v59, %v455_v58  ;;  %v1418_v63 = vpack.c.bf16 %v458_v62, %v457_v61  ;;  %v459_v0 = vld [vmem:[%s1701_s5 + $0x60] sm:$0xff]  ;;  %v460_v1 = vld [vmem:[%s1701_s5 + $0x68] sm:$0xff]  ;;  %v461_v52 = vld [vmem:[%s1701_s5 + $0x70] sm:$0xff] }
  0x12   :  { %1102 = vmatpush3.bf16.msra.mxu0 %v1099_v49  ;;  %v1428_v2 = vpack.c.bf16 %v460_v1, %v459_v0  ;;  %v1436_v3 = vld [vmem:[%s1702_s2] ss:$0 sm:$0xff]  ;;  %v462_v53 = vld [vmem:[%s1701_s5 + $0x78] sm:$0xff] }
  0x13   :  { %1082 = vmatpush3.bf16.msra.mxu1 %v1079_v23  ;;  %1104 = vmatprep.subr.bf16.mxu0 %v1103_v51  ;;  %v829_v55 = vld [vmem:[%s1703_s4] ss:$0 sm:$0xff] }
  0x14   :  { %930 = vmatmul.mubr.msk.f32.gmra.mrb[4].mxu0 %vm53_vm0, %v31_v22  ;;  %1084 = vmatprep.subr.bf16.mxu1 %v1083_v28 }
  0x15   :  { %932 = vmatprep.mubr.msk.f32.mxu0 %vm53_vm0, %v32_v24 }
  0x16   :  { %1106 = vmatpush3.bf16.msra.mxu0 %v1103_v51 }
  0x17   :  { %1086 = vmatpush3.bf16.msra.mxu1 %v1083_v28  ;;  %1108 = vmatprep.subr.bf16.mxu0 %v1107_v54 }
  0x18   :  { %933 = vmatmul.mubr.msk.f32.gmra.mrb[6].mxu0 %vm53_vm0, %v33_v27  ;;  %1088 = vmatprep.subr.bf16.mxu1 %v1087_v33 }
  0x19   :  { %935 = vmatprep.mubr.msk.f32.mxu0 %vm53_vm0, %v34_v29 }
  0x1a   :  { %1110 = vmatpush3.bf16.msra.mxu0 %v1107_v54 }
  0x1b   :  { %1090 = vmatpush3.bf16.msra.mxu1 %v1087_v33  ;;  %1112 = vmatprep.subr.bf16.mxu0 %v1399_v57 }
  0x1c   :  { %936 = vmatmul.mubr.msk.f32.gmra.mrb[8].mxu0 %vm53_vm0, %v35_v32  ;;  %1092 = vmatprep.subr.bf16.mxu1 %v1091_v38 }
  0x1d   :  { %938 = vmatprep.mubr.msk.f32.mxu0 %vm53_vm0, %v36_v34 }
  0x1e   :  { %1114 = vmatpush3.bf16.msra.mxu0 %v1399_v57 }
  0x1f   :  { %1094 = vmatpush3.bf16.msra.mxu1 %v1091_v38  ;;  %1116 = vmatprep.subr.bf16.mxu0 %v1408_v60 }
  0x20   :  { %939 = vmatmul.mubr.msk.f32.gmra.mrb[10].mxu0 %vm53_vm0, %v37_v37  ;;  %1096 = vmatprep.subr.bf16.mxu1 %v1095_v45 }
  0x21   :  { %941 = vmatprep.mubr.msk.f32.mxu0 %vm53_vm0, %v38_v39 }
  0x22   :  { %1118 = vmatpush3.bf16.msra.mxu0 %v1408_v60 }
  0x23   :  { %1098 = vmatpush3.bf16.msra.mxu1 %v1095_v45  ;;  %1120 = vmatprep.subr.bf16.mxu0 %v1418_v63 }
  0x24   :  { %942 = vmatmul.mubr.msk.f32.gmra.mrb[12].mxu0 %vm53_vm0, %v39_v40  ;;  %1131 = vmatprep.subr.bf16.mxu1 %v1099_v49 }
  0x25   :  { %944 = vmatprep.mubr.msk.f32.mxu0 %vm53_vm0, %v40_v41 }
  0x26   :  { %1122 = vmatpush3.bf16.msra.mxu0 %v1418_v63 }
  0x27   :  { %1124 = vmatprep.subr.bf16.mxu0 %v1428_v2 }
  0x28   :  { %945 = vmatmul.mubr.msk.f32.gmra.mrb[14].mxu0 %vm53_vm0, %v41_v42 }
  0x2a   :  { %1126 = vmatpush3.bf16.msra.mxu0 %v1428_v2 }
  0xdf   :  { %v925_v4 = vpop.f32.mrb[0].mxu0 }
  0xe0   :  { %v174_v5 = vadd.f32 %v925_v4, %v1436_v3  ;;  %v168_v6 = vpop.f32.mrb[1].mxu0 }
  0xe1   :  { %v169_v7 = vadd.f32 %v1436_v3, %v168_v6 }
  0xe2   :  { %v248_v10 = vmax.f32 %v174_v5, 0.0 }
  0xe3   :  { %v928_v8 = vpop.f32.mrb[2].mxu0  ;;  %v247_v9 = vmax.f32 %v169_v7, 0.0 }
  0xe4   :  { %v184_v11 = vadd.f32 %v928_v8, %v1436_v3  ;;  %v178_v12 = vpop.f32.mrb[3].mxu0 }
  0xe5   :  { %v179_v13 = vadd.f32 %v1436_v3, %v178_v12  ;;  %979 = vmatprep.mubr.f32.mxu1 %v247_v9 }
  0xe6   :  { %980 = vmatmul.mubr.f32.vlgmr.msra.gmra.mrb[0].mxu1 %v248_v10  ;;  %v250_v16 = vmax.f32 %v184_v11, 0.0 }
  0xe7   :  { %v249_v14 = vmax.f32 %v179_v13, 0.0  ;;  %v931_v15 = vpop.f32.mrb[4].mxu0  ;;  %1139 = vmatpush3.bf16.msra.mxu1 %v1099_v49 }
  0xe8   :  { %v194_v17 = vadd.f32 %v931_v15, %v1436_v3  ;;  %v188_v18 = vpop.f32.mrb[5].mxu0  ;;  %1132 = vmatprep.subr.bf16.mxu1 %v1103_v51 }
  0xe9   :  { %v189_v19 = vadd.f32 %v1436_v3, %v188_v18  ;;  %982 = vmatprep.mubr.f32.mxu1 %v249_v14 }
  0xea   :  { %v252_v20 = vmax.f32 %v194_v17, 0.0  ;;  %983 = vmatmul.mubr.f32.gmra.mrb[2].mxu1 %v250_v16 }
  0xeb   :  { %v251_v21 = vmax.f32 %v189_v19, 0.0  ;;  %v934_v22 = vpop.f32.mrb[6].mxu0  ;;  %1140 = vmatpush3.bf16.msra.mxu1 %v1103_v51 }
  0xec   :  { %v204_v23 = vadd.f32 %v934_v22, %v1436_v3  ;;  %v198_v24 = vpop.f32.mrb[7].mxu0  ;;  %1133 = vmatprep.subr.bf16.mxu1 %v1107_v54 }
  0xed   :  { %v199_v25 = vadd.f32 %v1436_v3, %v198_v24  ;;  %985 = vmatprep.mubr.f32.mxu1 %v251_v21 }
  0xee   :  { %v254_v26 = vmax.f32 %v204_v23, 0.0  ;;  %986 = vmatmul.mubr.f32.gmra.mrb[4].mxu1 %v252_v20 }
  0xef   :  { %v253_v27 = vmax.f32 %v199_v25, 0.0  ;;  %v937_v28 = vpop.f32.mrb[8].mxu0  ;;  %1141 = vmatpush3.bf16.msra.mxu1 %v1107_v54  ;;  %v1127_v54 = vpack.c.bf16 %v462_v53, %v461_v52 }
  0xf0   :  { %v214_v29 = vadd.f32 %v937_v28, %v1436_v3  ;;  %v208_v30 = vpop.f32.mrb[9].mxu0  ;;  %1134 = vmatprep.subr.bf16.mxu1 %v1399_v57 }
  0xf1   :  { %v209_v31 = vadd.f32 %v1436_v3, %v208_v30  ;;  %988 = vmatprep.mubr.f32.mxu1 %v253_v27  ;;  %1128 = vmatprep.subr.bf16.mxu0 %v1127_v54 }
  0xf2   :  { %v256_v32 = vmax.f32 %v214_v29, 0.0  ;;  %989 = vmatmul.mubr.f32.gmra.mrb[6].mxu1 %v254_v26  ;;  %1130 = vmatpush3.bf16.msra.mxu0 %v1127_v54 }
  0xf3   :  { %v255_v33 = vmax.f32 %v209_v31, 0.0  ;;  %v940_v34 = vpop.f32.mrb[10].mxu0  ;;  %1142 = vmatpush3.bf16.msra.mxu1 %v1399_v57 }
  0xf4   :  { %v224_v35 = vadd.f32 %v940_v34, %v1436_v3  ;;  %v218_v36 = vpop.f32.mrb[11].mxu0  ;;  %1135 = vmatprep.subr.bf16.mxu1 %v1408_v60 }
  0xf5   :  { %v219_v37 = vadd.f32 %v1436_v3, %v218_v36  ;;  %991 = vmatprep.mubr.f32.mxu1 %v255_v33 }
  0xf6   :  { %v258_v38 = vmax.f32 %v224_v35, 0.0  ;;  %992 = vmatmul.mubr.f32.gmra.mrb[8].mxu1 %v256_v32 }
  0xf7   :  { %v257_v39 = vmax.f32 %v219_v37, 0.0  ;;  %v943_v40 = vpop.f32.mrb[12].mxu0  ;;  %1143 = vmatpush3.bf16.msra.mxu1 %v1408_v60 }
  0xf8   :  { %v234_v41 = vadd.f32 %v943_v40, %v1436_v3  ;;  %v228_v42 = vpop.f32.mrb[13].mxu0  ;;  %1136 = vmatprep.subr.bf16.mxu1 %v1418_v63  ;;  %v830_v40 = vld [vmem:[%s1704_s6] ss:$0 sm:$0xff] }
  0xf9   :  { %v229_v43 = vadd.f32 %v1436_v3, %v228_v42  ;;  %994 = vmatprep.mubr.f32.mxu1 %v257_v39 }
  0xfa   :  { %v260_v44 = vmax.f32 %v234_v41, 0.0  ;;  %995 = vmatmul.mubr.f32.gmra.mrb[10].mxu1 %v258_v38 }
  0xfb   :  { %v259_v45 = vmax.f32 %v229_v43, 0.0  ;;  %v946_v46 = vpop.f32.mrb[14].mxu0  ;;  %1144 = vmatpush3.bf16.msra.mxu1 %v1418_v63 }
  0xfc   :  { %v244_v47 = vadd.f32 %v946_v46, %v1436_v3  ;;  %v238_v48 = vpop.f32.mrb[15].mxu0  ;;  %1137 = vmatprep.subr.bf16.mxu1 %v1428_v2 }
  0xfd   :  { %v239_v49 = vadd.f32 %v1436_v3, %v238_v48  ;;  %997 = vmatprep.mubr.f32.mxu1 %v259_v45 }
  0xfe   :  { %v262_v50 = vmax.f32 %v244_v47, 0.0  ;;  %998 = vmatmul.mubr.f32.gmra.mrb[12].mxu1 %v260_v44 }
  0xff   :  { %v261_v51 = vmax.f32 %v239_v49, 0.0  ;;  %1145 = vmatpush3.bf16.msra.mxu1 %v1428_v2 }
 0x100   :  { %1138 = vmatprep.subr.bf16.mxu1 %v1127_v54 }
 0x101   :  { %1000 = vmatprep.mubr.f32.mxu1 %v261_v51 }
 0x102   :  { %1001 = vmatmul.mubr.f32.gmra.mrb[14].mxu1 %v262_v50 }
 0x103   :  { %1146 = vmatpush3.bf16.msra.mxu1 %v1127_v54 }
 0x1b9   :  { %v981_v56 = vpop.f32.mrb[0].mxu1 }
 0x1ba   :  { %v358_v57 = vadd.f32 %v981_v56, %v829_v55  ;;  %v352_v58 = vpop.f32.mrb[1].mxu1 }
 0x1bb   :  { %v353_v59 = vadd.f32 %v829_v55, %v352_v58 }
 0x1bc   :  { %v432_v62 = vmax.f32 %v358_v57, 0.0 }
 0x1bd   :  { %v431_v60 = vmax.f32 %v353_v59, 0.0  ;;  %v984_v61 = vpop.f32.mrb[2].mxu1 }
 0x1be   :  { %v368_v63 = vadd.f32 %v984_v61, %v829_v55  ;;  %v362_v0 = vpop.f32.mrb[3].mxu1 }
 0x1bf   :  { %v363_v1 = vadd.f32 %v829_v55, %v362_v0  ;;  %1035 = vmatprep.mubr.f32.mxu0 %v431_v60 }
 0x1c0   :  { %1036 = vmatmul.mubr.f32.vlgmr.msra.gmra.mrb[16].mxu0 %v432_v62  ;;  %v434_v4 = vmax.f32 %v368_v63, 0.0 }
 0x1c1   :  { %v433_v2 = vmax.f32 %v363_v1, 0.0  ;;  %v987_v3 = vpop.f32.mrb[4].mxu1 }
 0x1c2   :  { %v378_v5 = vadd.f32 %v987_v3, %v829_v55  ;;  %v372_v6 = vpop.f32.mrb[5].mxu1 }
 0x1c3   :  { %v373_v7 = vadd.f32 %v829_v55, %v372_v6  ;;  %1038 = vmatprep.mubr.f32.mxu0 %v433_v2 }
 0x1c4   :  { %v436_v8 = vmax.f32 %v378_v5, 0.0  ;;  %1039 = vmatmul.mubr.f32.gmra.mrb[18].mxu0 %v434_v4 }
 0x1c5   :  { %v435_v9 = vmax.f32 %v373_v7, 0.0  ;;  %v990_v10 = vpop.f32.mrb[6].mxu1 }
 0x1c6   :  { %v388_v11 = vadd.f32 %v990_v10, %v829_v55  ;;  %v382_v12 = vpop.f32.mrb[7].mxu1 }
 0x1c7   :  { %v383_v13 = vadd.f32 %v829_v55, %v382_v12  ;;  %1041 = vmatprep.mubr.f32.mxu0 %v435_v9 }
 0x1c8   :  { %v438_v14 = vmax.f32 %v388_v11, 0.0  ;;  %1042 = vmatmul.mubr.f32.gmra.mrb[20].mxu0 %v436_v8 }
 0x1c9   :  { %v437_v15 = vmax.f32 %v383_v13, 0.0  ;;  %v993_v16 = vpop.f32.mrb[8].mxu1 }
 0x1ca   :  { %v398_v17 = vadd.f32 %v993_v16, %v829_v55  ;;  %v392_v18 = vpop.f32.mrb[9].mxu1 }
 0x1cb   :  { %v393_v19 = vadd.f32 %v829_v55, %v392_v18  ;;  %1044 = vmatprep.mubr.f32.mxu0 %v437_v15 }
 0x1cc   :  { %v440_v20 = vmax.f32 %v398_v17, 0.0  ;;  %1045 = vmatmul.mubr.f32.gmra.mrb[22].mxu0 %v438_v14 }
 0x1cd   :  { %v439_v21 = vmax.f32 %v393_v19, 0.0  ;;  %v996_v22 = vpop.f32.mrb[10].mxu1 }
 0x1ce   :  { %v408_v23 = vadd.f32 %v996_v22, %v829_v55  ;;  %v402_v24 = vpop.f32.mrb[11].mxu1 }
 0x1cf   :  { %v403_v25 = vadd.f32 %v829_v55, %v402_v24  ;;  %1047 = vmatprep.mubr.f32.mxu0 %v439_v21 }
 0x1d0   :  { %v442_v26 = vmax.f32 %v408_v23, 0.0  ;;  %1048 = vmatmul.mubr.f32.gmra.mrb[24].mxu0 %v440_v20 }
 0x1d1   :  { %v441_v27 = vmax.f32 %v403_v25, 0.0  ;;  %v999_v28 = vpop.f32.mrb[12].mxu1 }
 0x1d2   :  { %v418_v29 = vadd.f32 %v999_v28, %v829_v55  ;;  %v412_v30 = vpop.f32.mrb[13].mxu1 }
 0x1d3   :  { %v413_v31 = vadd.f32 %v829_v55, %v412_v30  ;;  %1050 = vmatprep.mubr.f32.mxu0 %v441_v27 }
 0x1d4   :  { %v444_v32 = vmax.f32 %v418_v29, 0.0  ;;  %1051 = vmatmul.mubr.f32.gmra.mrb[26].mxu0 %v442_v26 }
 0x1d5   :  { %v443_v33 = vmax.f32 %v413_v31, 0.0  ;;  %v1002_v34 = vpop.f32.mrb[14].mxu1 }
 0x1d6   :  { %v428_v35 = vadd.f32 %v1002_v34, %v829_v55  ;;  %v422_v36 = vpop.f32.mrb[15].mxu1 }
 0x1d7   :  { %v423_v37 = vadd.f32 %v829_v55, %v422_v36  ;;  %1053 = vmatprep.mubr.f32.mxu0 %v443_v33 }
 0x1d8   :  { %v446_v38 = vmax.f32 %v428_v35, 0.0  ;;  %1054 = vmatmul.mubr.f32.gmra.mrb[28].mxu0 %v444_v32 }
 0x1d9   :  { %v445_v39 = vmax.f32 %v423_v37, 0.0 }
 0x1db   :  { %1056 = vmatprep.mubr.f32.mxu1 %v445_v39 }
 0x1dc   :  { %1057 = vmatmul.mubr.f32.vlgmr.msra.gmra.mrb[16].mxu1 %v446_v38 }
 0x293   :  { %v1037_v41 = vpop.f32.mrb[16].mxu0 }
 0x294   :  { %v1474_v42 = vadd.f32 %v1037_v41, %v830_v40  ;;  %v536_v43 = vpop.f32.mrb[17].mxu0 }
 0x295   :  { %v1476_v44 = vadd.f32 %v830_v40, %v536_v43 }
 0x296   :  { %v619_v45 = vsel %vm615_vm1, %v1474_v42, -inf }
 0x297   :  { %620 = vmax.xlane.f32.xlu0 %v619_v45  ;;  %v1040_v46 = vpop.f32.mrb[18].mxu0  ;;  %v616_v51 = vsel %vm615_vm1, %v1476_v44, -inf }
 0x298   :  { %v1480_v47 = vadd.f32 %v1040_v46, %v830_v40  ;;  %v546_v48 = vpop.f32.mrb[19].mxu0 }
 0x299   :  { %v1482_v49 = vadd.f32 %v830_v40, %v546_v48 }
 0x29a   :  { %v625_v50 = vsel %vm615_vm1, %v1480_v47, -inf }
 0x29b   :  { %626 = vmax.xlane.f32.xlu1 %v625_v50  ;;  %v1043_v52 = vpop.f32.mrb[20].mxu0  ;;  %617 = vmax.xlane.f32.xlu0 %v616_v51  ;;  %v622_v56 = vsel %vm615_vm1, %v1482_v49, -inf }
 0x29c   :  { %v556_v53 = vpop.f32.mrb[21].mxu0  ;;  %v1490_v55 = vadd.f32 %v1043_v52, %v830_v40 }
 0x29d   :  { %v1488_v54 = vadd.f32 %v830_v40, %v556_v53 }
 0x29e   :  { %v631_v62 = vsel %vm615_vm1, %v1490_v55, -inf }
 0x29f   :  { %v1046_v57 = vpop.f32.mrb[22].mxu0  ;;  %623 = vmax.xlane.f32.xlu1 %v622_v56  ;;  %v628_v58 = vsel %vm615_vm1, %v1488_v54, -inf }
 0x2a0   :  { %v566_v59 = vpop.f32.mrb[23].mxu0  ;;  %629 = vmax.xlane.f32.xlu0 %v628_v58  ;;  %v1498_v61 = vadd.f32 %v1046_v57, %v830_v40 }
 0x2a1   :  { %v1496_v60 = vadd.f32 %v830_v40, %v566_v59 }
 0x2a2   :  { %v637_v4 = vsel %vm615_vm1, %v1498_v61, -inf }
 0x2a3   :  { %v1049_v63 = vpop.f32.mrb[24].mxu0  ;;  %632 = vmax.xlane.f32.xlu1 %v631_v62  ;;  %v634_v0 = vsel %vm615_vm1, %v1496_v60, -inf }
 0x2a4   :  { %v576_v1 = vpop.f32.mrb[25].mxu0  ;;  %635 = vmax.xlane.f32.xlu0 %v634_v0  ;;  %v1506_v3 = vadd.f32 %v1049_v63, %v830_v40 }
 0x2a5   :  { %v1504_v2 = vadd.f32 %v830_v40, %v576_v1 }
 0x2a6   :  { %v643_v10 = vsel %vm615_vm1, %v1506_v3, -inf }
 0x2a7   :  { %v1052_v5 = vpop.f32.mrb[26].mxu0  ;;  %638 = vmax.xlane.f32.xlu1 %v637_v4  ;;  %v640_v6 = vsel %vm615_vm1, %v1504_v2, -inf }
 0x2a8   :  { %v586_v7 = vpop.f32.mrb[27].mxu0  ;;  %641 = vmax.xlane.f32.xlu0 %v640_v6  ;;  %v1514_v9 = vadd.f32 %v1052_v5, %v830_v40 }
 0x2a9   :  { %v1512_v8 = vadd.f32 %v830_v40, %v586_v7 }
 0x2aa   :  { %v649_v16 = vsel %vm615_vm1, %v1514_v9, -inf }
 0x2ab   :  { %v1055_v11 = vpop.f32.mrb[28].mxu0  ;;  %644 = vmax.xlane.f32.xlu1 %v643_v10  ;;  %v646_v12 = vsel %vm615_vm1, %v1512_v8, -inf }
 0x2ac   :  { %v596_v13 = vpop.f32.mrb[29].mxu0  ;;  %647 = vmax.xlane.f32.xlu0 %v646_v12  ;;  %v1522_v15 = vadd.f32 %v1055_v11, %v830_v40 }
 0x2ad   :  { %v1520_v14 = vadd.f32 %v830_v40, %v596_v13 }
 0x2ae   :  { %v655_v22 = vsel %vm615_vm1, %v1522_v15, -inf }
 0x2af   :  { %v1058_v17 = vpop.f32.mrb[16].mxu1  ;;  %650 = vmax.xlane.f32.xlu1 %v649_v16  ;;  %v652_v18 = vsel %vm615_vm1, %v1520_v14, -inf }
 0x2b0   :  { %v606_v19 = vpop.f32.mrb[17].mxu1  ;;  %653 = vmax.xlane.f32.xlu0 %v652_v18  ;;  %v1530_v21 = vadd.f32 %v1058_v17, %v830_v40 }
 0x2b1   :  { %v1528_v20 = vadd.f32 %v830_v40, %v606_v19 }
 0x2b2   :  { %v661_v24 = vsel %vm615_vm1, %v1530_v21, -inf }
 0x2b3   :  { %656 = vmax.xlane.f32.xlu1 %v655_v22  ;;  %v658_v23 = vsel %vm615_vm1, %v1528_v20, -inf }
 0x2b4   :  { %659 = vmax.xlane.f32.xlu0 %v658_v23 }
 0x2b7   :  { %662 = vmax.xlane.f32.xlu1 %v661_v24 }
 0x324   :  { %v621_v25 = vpop.xlane.xlu0 %620 }
 0x325   :  { %v665_v26 = vsub.f32 %v1474_v42, %v621_v25 }
 0x327   :  { %v682_v27 = vmul.f32 1.442695, %v665_v26 }
 0x328   :  { %v627_v28 = vpop.xlane.xlu1 %626  ;;  %v618_v29 = vpop.xlane.xlu0 %617 }
 0x329   :  { %1147 = vpow2.f32 %v682_v27  ;;  %v667_v30 = vsub.f32 %v1480_v47, %v627_v28  ;;  %v664_v31 = vsub.f32 %v1476_v44, %v618_v29 }
 0x32b   :  { %v686_v32 = vmul.f32 1.442695, %v667_v30  ;;  %v680_v33 = vmul.f32 1.442695, %v664_v31 }
 0x32c   :  { %v624_v34 = vpop.xlane.xlu1 %623 }
 0x32d   :  { %1149 = vpow2.f32 %v686_v32  ;;  %v666_v35 = vsub.f32 %v1482_v49, %v624_v34  ;;  %v630_v36 = vpop.xlane.xlu0 %629 }
 0x32e   :  { %1151 = vpow2.f32 %v680_v33  ;;  %v668_v37 = vsub.f32 %v1488_v54, %v630_v36 }
 0x32f   :  { %v684_v38 = vmul.f32 1.442695, %v666_v35 }
 0x330   :  { %v688_v39 = vmul.f32 1.442695, %v668_v37  ;;  %v633_v40 = vpop.xlane.xlu1 %632 }
 0x331   :  { %1153 = vpow2.f32 %v684_v38  ;;  %v669_v41 = vsub.f32 %v1490_v55, %v633_v40  ;;  %v636_v42 = vpop.xlane.xlu0 %635 }
 0x332   :  { %v670_v43 = vsub.f32 %v1496_v60, %v636_v42  ;;  %1155 = vpow2.f32 %v688_v39 }
 0x333   :  { %v1545_v44 = vpop.eup %1147  ;;  %v690_v45 = vmul.f32 1.442695, %v669_v41 }
 0x334   :  { %v692_v46 = vmul.f32 1.442695, %v670_v43  ;;  %v639_v47 = vpop.xlane.xlu1 %638  ;;  %v715_v48 = vsel %vm615_vm1, %v1545_v44, 0.0 }
 0x335   :  { %1157 = vpow2.f32 %v690_v45  ;;  %v671_v49 = vsub.f32 %v1498_v61, %v639_v47  ;;  %716 = vadd.xlane.f32.xlu1 %v715_v48  ;;  %v642_v50 = vpop.xlane.xlu0 %641 }
 0x336   :  { %v672_v51 = vsub.f32 %v1504_v2, %v642_v50  ;;  %1159 = vpow2.f32 %v692_v46 }
 0x337   :  { %v1551_v52 = vpop.eup %1149  ;;  %v694_v53 = vmul.f32 1.442695, %v671_v49 }
 0x338   :  { %v1553_v54 = vpop.eup %1151  ;;  %v696_v55 = vmul.f32 1.442695, %v672_v51  ;;  %v645_v56 = vpop.xlane.xlu1 %644  ;;  %v721_v57 = vsel %vm615_vm1, %v1551_v52, 0.0 }
 0x339   :  { %1161 = vpow2.f32 %v694_v53  ;;  %v673_v58 = vsub.f32 %v1506_v3, %v645_v56  ;;  %722 = vadd.xlane.f32.xlu1 %v721_v57  ;;  %v712_v59 = vsel %vm615_vm1, %v1553_v54, 0.0  ;;  %v648_v60 = vpop.xlane.xlu0 %647 }
 0x33a   :  { %713 = vadd.xlane.f32.xlu0 %v712_v59  ;;  %v674_v61 = vsub.f32 %v1512_v8, %v648_v60  ;;  %1163 = vpow2.f32 %v696_v55 }
 0x33b   :  { %v1561_v62 = vpop.eup %1153  ;;  %v698_v63 = vmul.f32 1.442695, %v673_v58 }
 0x33c   :  { %v700_v0 = vmul.f32 1.442695, %v674_v61  ;;  %v651_v1 = vpop.xlane.xlu1 %650  ;;  %v718_v2 = vsel %vm615_vm1, %v1561_v62, 0.0  ;;  %v1566_v5 = vpop.eup %1155 }
 0x33d   :  { %1165 = vpow2.f32 %v698_v63  ;;  %v675_v3 = vsub.f32 %v1514_v9, %v651_v1  ;;  %v654_v4 = vpop.xlane.xlu0 %653  ;;  %v724_v9 = vsel %vm615_vm1, %v1566_v5, 0.0 }
 0x33e   :  { %719 = vadd.xlane.f32.xlu0 %v718_v2  ;;  %v676_v6 = vsub.f32 %v1520_v14, %v654_v4  ;;  %1167 = vpow2.f32 %v700_v0 }
 0x33f   :  { %v1569_v7 = vpop.eup %1157  ;;  %v702_v8 = vmul.f32 1.442695, %v675_v3 }
 0x340   :  { %v704_v10 = vmul.f32 1.442695, %v676_v6  ;;  %v657_v11 = vpop.xlane.xlu1 %656  ;;  %v727_v12 = vsel %vm615_vm1, %v1569_v7, 0.0  ;;  %v1576_v17 = vpop.eup %1159 }
 0x341   :  { %1169 = vpow2.f32 %v702_v8  ;;  %v677_v13 = vsub.f32 %v1522_v15, %v657_v11  ;;  %728 = vadd.xlane.f32.xlu1 %v727_v12  ;;  %v660_v16 = vpop.xlane.xlu0 %659  ;;  %v730_v25 = vsel %vm615_vm1, %v1576_v17, 0.0 }
 0x342   :  { %725 = vadd.xlane.f32.xlu0 %v724_v9  ;;  %v678_v14 = vsub.f32 %v1528_v20, %v660_v16  ;;  %1171 = vpow2.f32 %v704_v10 }
 0x343   :  { %v1579_v18 = vpop.eup %1161  ;;  %v706_v19 = vmul.f32 1.442695, %v677_v13 }
 0x344   :  { %v708_v22 = vmul.f32 1.442695, %v678_v14  ;;  %v663_v23 = vpop.xlane.xlu1 %662  ;;  %v733_v24 = vsel %vm615_vm1, %v1579_v18, 0.0  ;;  %v1586_v26 = vpop.eup %1163 }
 0x345   :  { %1173 = vpow2.f32 %v706_v19  ;;  %v679_v15 = vsub.f32 %v1530_v21, %v663_v23  ;;  %734 = vadd.xlane.f32.xlu1 %v733_v24  ;;  %v736_v29 = vsel %vm615_vm1, %v1586_v26, 0.0 }
 0x346   :  { %731 = vadd.xlane.f32.xlu0 %v730_v25  ;;  %1175 = vpow2.f32 %v708_v22 }
 0x347   :  { %v1588_v20 = vpop.eup %1165  ;;  %v710_v27 = vmul.f32 1.442695, %v679_v15 }
 0x348   :  { %v739_v28 = vsel %vm615_vm1, %v1588_v20, 0.0  ;;  %v1594_v21 = vpop.eup %1167 }
 0x349   :  { %1177 = vpow2.f32 %v710_v27  ;;  %740 = vadd.xlane.f32.xlu1 %v739_v28  ;;  %v742_v32 = vsel %vm615_vm1, %v1594_v21, 0.0 }
 0x34a   :  { %737 = vadd.xlane.f32.xlu0 %v736_v29 }
 0x34b   :  { %v1596_v30 = vpop.eup %1169 }
 0x34c   :  { %v745_v31 = vsel %vm615_vm1, %v1596_v30, 0.0  ;;  %v1602_v33 = vpop.eup %1171 }
 0x34d   :  { %746 = vadd.xlane.f32.xlu1 %v745_v31  ;;  %v748_v36 = vsel %vm615_vm1, %v1602_v33, 0.0 }
 0x34e   :  { %743 = vadd.xlane.f32.xlu0 %v742_v32 }
 0x34f   :  { %v1604_v34 = vpop.eup %1173 }
 0x350   :  { %v751_v35 = vsel %vm615_vm1, %v1604_v34, 0.0  ;;  %v1610_v37 = vpop.eup %1175 }
 0x351   :  { %752 = vadd.xlane.f32.xlu1 %v751_v35  ;;  %v754_v40 = vsel %vm615_vm1, %v1610_v37, 0.0 }
 0x352   :  { %749 = vadd.xlane.f32.xlu0 %v748_v36 }
 0x353   :  { %v1612_v38 = vpop.eup %1177 }
 0x354   :  { %v757_v39 = vsel %vm615_vm1, %v1612_v38, 0.0 }
 0x355   :  { %758 = vadd.xlane.f32.xlu1 %v757_v39 }
 0x356   :  { %755 = vadd.xlane.f32.xlu0 %v754_v40 }
 0x3c2   :  { %v717_v41 = vpop.xlane.xlu1 %716 }
 0x3c3   :  { %1179 = vrcp.f32 %v717_v41 }
 0x3c6   :  { %v723_v42 = vpop.xlane.xlu1 %722 }
 0x3c7   :  { %1181 = vrcp.f32 %v723_v42  ;;  %v714_v43 = vpop.xlane.xlu0 %713 }
 0x3c8   :  { %1183 = vrcp.f32 %v714_v43 }
 0x3cb   :  { %v720_v45 = vpop.xlane.xlu0 %719 }
 0x3cc   :  { %1185 = vrcp.f32 %v720_v45 }
 0x3cd   :  { %v1180_v46 = vpop.eup %1179 }
 0x3ce   :  { %v777_v47 = vmul.f32 %v1180_v46, %v1545_v44  ;;  %v729_v48 = vpop.xlane.xlu1 %728 }
 0x3cf   :  { %1187 = vrcp.f32 %v729_v48  ;;  %v726_v49 = vpop.xlane.xlu0 %725 }
 0x3d0   :  { %793 = vst.msk [vmem:[%s1705_s7 + $0x8] sm:$0xff] %vm615_vm1, %v777_v47  ;;  %1189 = vrcp.f32 %v726_v49 }
 0x3d1   :  { %v1182_v50 = vpop.eup %1181 }
 0x3d2   :  { %v1184_v51 = vpop.eup %1183  ;;  %v779_v53 = vmul.f32 %v1182_v50, %v1551_v52  ;;  %v735_v55 = vpop.xlane.xlu1 %734 }
 0x3d3   :  { %v776_v56 = vmul.f32 %v1184_v51, %v1553_v54  ;;  %1191 = vrcp.f32 %v735_v55  ;;  %v732_v57 = vpop.xlane.xlu0 %731 }
 0x3d4   :  { %795 = vst.msk [vmem:[%s1705_s7 + $0x18] sm:$0xff] %vm615_vm1, %v779_v53  ;;  %1193 = vrcp.f32 %v732_v57 }
 0x3d5   :  { %792 = vst.msk [vmem:[%s1705_s7] sm:$0xff] %vm615_vm1, %v776_v56 }
 0x3d6   :  { %v1186_v44 = vpop.eup %1185  ;;  %v741_v58 = vpop.xlane.xlu1 %740 }
 0x3d7   :  { %v778_v52 = vmul.f32 %v1186_v44, %v1561_v62  ;;  %1195 = vrcp.f32 %v741_v58  ;;  %v738_v59 = vpop.xlane.xlu0 %737 }
 0x3d8   :  { %1197 = vrcp.f32 %v738_v59 }
 0x3d9   :  { %v1188_v54 = vpop.eup %1187  ;;  %794 = vst.msk [vmem:[%s1705_s7 + $0x10] sm:$0xff] %vm615_vm1, %v778_v52 }
 0x3da   :  { %v1190_v60 = vpop.eup %1189  ;;  %v781_v61 = vmul.f32 %v1188_v54, %v1569_v7  ;;  %v747_v63 = vpop.xlane.xlu1 %746 }
 0x3db   :  { %v780_v0 = vmul.f32 %v1190_v60, %v1566_v5  ;;  %1199 = vrcp.f32 %v747_v63  ;;  %v744_v1 = vpop.xlane.xlu0 %743 }
 0x3dc   :  { %797 = vst.msk [vmem:[%s1705_s7 + $0x28] sm:$0xff] %vm615_vm1, %v781_v61  ;;  %1201 = vrcp.f32 %v744_v1 }
 0x3dd   :  { %v1192_v62 = vpop.eup %1191  ;;  %796 = vst.msk [vmem:[%s1705_s7 + $0x20] sm:$0xff] %vm615_vm1, %v780_v0 }
 0x3de   :  { %v1194_v2 = vpop.eup %1193  ;;  %v783_v3 = vmul.f32 %v1192_v62, %v1579_v18  ;;  %v753_v4 = vpop.xlane.xlu1 %752 }
 0x3df   :  { %v782_v5 = vmul.f32 %v1194_v2, %v1576_v17  ;;  %1203 = vrcp.f32 %v753_v4  ;;  %v750_v6 = vpop.xlane.xlu0 %749 }
 0x3e0   :  { %799 = vst.msk [vmem:[%s1705_s7 + $0x38] sm:$0xff] %vm615_vm1, %v783_v3  ;;  %1205 = vrcp.f32 %v750_v6 }
 0x3e1   :  { %v1196_v7 = vpop.eup %1195  ;;  %798 = vst.msk [vmem:[%s1705_s7 + $0x30] sm:$0xff] %vm615_vm1, %v782_v5 }
 0x3e2   :  { %v1198_v8 = vpop.eup %1197  ;;  %v785_v10 = vmul.f32 %v1196_v7, %v1588_v20  ;;  %v759_v11 = vpop.xlane.xlu1 %758 }
 0x3e3   :  { %v784_v12 = vmul.f32 %v1198_v8, %v1586_v26  ;;  %1207 = vrcp.f32 %v759_v11  ;;  %v756_v13 = vpop.xlane.xlu0 %755 }
 0x3e4   :  { %801 = vst.msk [vmem:[%s1705_s7 + $0x48] sm:$0xff] %vm615_vm1, %v785_v10  ;;  %1209 = vrcp.f32 %v756_v13 }
 0x3e5   :  { %v1200_v9 = vpop.eup %1199  ;;  %800 = vst.msk [vmem:[%s1705_s7 + $0x40] sm:$0xff] %vm615_vm1, %v784_v12 }
 0x3e6   :  { %v1202_v16 = vpop.eup %1201  ;;  %v787_v17 = vmul.f32 %v1200_v9, %v1596_v30 }
 0x3e7   :  { %v786_v14 = vmul.f32 %v1202_v16, %v1594_v21 }
 0x3e8   :  { %803 = vst.msk [vmem:[%s1705_s7 + $0x58] sm:$0xff] %vm615_vm1, %v787_v17 }
 0x3e9   :  { %v1204_v18 = vpop.eup %1203  ;;  %802 = vst.msk [vmem:[%s1705_s7 + $0x50] sm:$0xff] %vm615_vm1, %v786_v14 }
 0x3ea   :  { %v1206_v19 = vpop.eup %1205  ;;  %v789_v22 = vmul.f32 %v1204_v18, %v1604_v34 }
 0x3eb   :  { %v788_v23 = vmul.f32 %v1206_v19, %v1602_v33 }
 0x3ec   :  { %805 = vst.msk [vmem:[%s1705_s7 + $0x68] sm:$0xff] %vm615_vm1, %v789_v22 }
 0x3ed   :  { %v1208_v24 = vpop.eup %1207  ;;  %804 = vst.msk [vmem:[%s1705_s7 + $0x60] sm:$0xff] %vm615_vm1, %v788_v23 }
 0x3ee   :  { %v1210_v15 = vpop.eup %1209  ;;  %v791_v25 = vmul.f32 %v1208_v24, %v1612_v38 }
 0x3ef   :  { %v790_v26 = vmul.f32 %v1210_v15, %v1610_v37 }
 0x3f0   :  { %807 = vst.msk [vmem:[%s1705_s7 + $0x78] sm:$0xff] %vm615_vm1, %v791_v25 }
 0x3f1   :  { %806 = vst.msk [vmem:[%s1705_s7 + $0x70] sm:$0xff] %vm615_vm1, %v790_v26 }

</bundles_post_ra>
